<compile_context>
chip_gen: v5e
topology: v5e:2x2
jax: 0.10.0
libtpu: 0.0.40
codegen_flags: <defaults>
</compile_context>

<pallas_src>
import functools
import inspect
import math

import jax
import jax.numpy as jnp
from jax.experimental import pallas as pl
from jax.experimental.pallas import tpu as pltpu

_SUBLANE = 8
_LANE = 128
_INV_SQRT2 = 1.0 / math.sqrt(2.0)

try:
    _HAS_SINGLE_BUFFER = (
        hasattr(pl, "Buffered")
        and "pipeline_mode" in inspect.signature(pl.BlockSpec).parameters
    )
except Exception:  # pragma: no cover - defensive
    _HAS_SINGLE_BUFFER = False


def _round_up(x: int, m: int) -> int:
    return ((x + m - 1) // m) * m


def _vmem_capacity_bytes() -> int:
    """Per-TensorCore VMEM capacity; conservative 64 MiB (v7x) fallback."""
    try:
        cap = int(pltpu.get_tpu_info().vmem_capacity_bytes)
        if cap > 0:
            return cap
    except Exception:
        pass
    return 64 << 20


def _num_tensorcores() -> int:
    """Best-effort TensorCore count (v7x has 2); default to 1."""
    try:
        info = pltpu.get_tpu_info()
        for attr in ("num_cores", "num_tensorcores", "tensorcore_count",
                     "cores_per_chip"):
            n = getattr(info, attr, None)
            if isinstance(n, int) and n >= 1:
                return n
    except Exception:
        pass
    return 1


def _single_buffered_spec(block_shape, index_map):
    """BlockSpec for a grid-invariant operand: 1-deep buffering if supported."""
    if _HAS_SINGLE_BUFFER:
        return pl.BlockSpec(block_shape, index_map, pipeline_mode=pl.Buffered(1))
    return pl.BlockSpec(block_shape, index_map)


# ----------------------------------------------------------------------------
# Kernels
# ----------------------------------------------------------------------------
def _gelu_exact_f32(h):
    # Exact (erf-based) GELU in f32 — matches torch.nn.GELU() default.
    return 0.5 * h * (1.0 + jax.lax.erf(h * _INV_SQRT2))


def _mlp_kernel_resident(x_ref, w1_ref, b1_ref, w2_ref, b2_ref, o_ref, *,
                         mxu_dtype=None):
    """Weights fully resident (single H chunk): y = GELU(x@W1+b1)@W2 + b2."""
    x = x_ref[...]
    w1 = w1_ref[...]
    w2 = w2_ref[...]
    if mxu_dtype is not None:
        x, w1, w2 = x.astype(mxu_dtype), w1.astype(mxu_dtype), w2.astype(mxu_dtype)

    h = jnp.dot(x, w1, preferred_element_type=jnp.float32)
    h = _gelu_exact_f32(h + b1_ref[...].astype(jnp.float32))
    # dropout(p=0.0) is the identity -> no-op.
    y = jnp.dot(h.astype(w2.dtype), w2, preferred_element_type=jnp.float32)
    o_ref[...] = (y + b2_ref[...].astype(jnp.float32)).astype(o_ref.dtype)


def _mlp_kernel_hchunk(x_ref, w1_ref, b1_ref, w2_ref, b2_ref, o_ref, acc_ref, *,
                       mxu_dtype=None):
    """H-chunked (K-tile) variant: accumulate partial fc2 products over chunks."""
    k = pl.program_id(1)

    @pl.when(k == 0)
    def _init():
        acc_ref[...] = jnp.zeros_like(acc_ref)

    x = x_ref[...]
    w1 = w1_ref[...]
    w2 = w2_ref[...]
    if mxu_dtype is not None:
        x, w1, w2 = x.astype(mxu_dtype), w1.astype(mxu_dtype), w2.astype(mxu_dtype)

    h = jnp.dot(x, w1, preferred_element_type=jnp.float32)
    h = _gelu_exact_f32(h + b1_ref[...].astype(jnp.float32))
    acc_ref[...] += jnp.dot(h.astype(w2.dtype), w2,
                            preferred_element_type=jnp.float32)

    @pl.when(k == pl.num_programs(1) - 1)
    def _finalize():
        o_ref[...] = (acc_ref[...] + b2_ref[...].astype(jnp.float32)
                      ).astype(o_ref.dtype)


# ----------------------------------------------------------------------------
# Tile selection / VMEM budgeting
# ----------------------------------------------------------------------------
def _vmem_need(tm, th, nk, cin, cout, isz):
    x_isz, w1_isz, b1_isz, w2_isz, b2_isz, out_isz = isz
    nbuf_w = 1 if nk == 1 else 2  # resident weights single-buffered; chunks pipelined
    w_bytes = nbuf_w * (cin * th * w1_isz + th * b1_isz + th * cout * w2_isz)
    w_bytes += cout * b2_isz
    io_bytes = 2 * tm * cin * x_isz + 2 * tm * cout * out_isz  # double-buffered tiles
    h_bytes = tm * th * 4                                       # f32 hidden (once)
    acc_bytes = 0 if nk == 1 else tm * cout * 4
    return w_bytes + io_bytes + h_bytes + acc_bytes


def _choose_tiles(m, cin, hdim, cout, isz, budget, tm=None, th=None):
    """Pick (tm, th, nk, Hp, vmem_need): largest row tile, full H preferred."""
    m_min = _round_up(m, _SUBLANE)
    if tm is not None:
        tm_cands = [min(_round_up(int(tm), _SUBLANE), m_min)]
    else:
        tm_cands = sorted({min(t, m_min) for t in (512, 256, 128, 64, 32, 16, 8)},
                          reverse=True)
    if th is not None:
        t = int(th)
        th_cands = [hdim] if t >= hdim else [max(_LANE, _round_up(t, _LANE))]
    else:
        th_cands = [hdim] + [c for c in (2048, 1024, 512, 256, 128) if c < hdim]

    def _expand(thc):
        if thc >= hdim:
            return hdim, hdim, 1
        hp = _round_up(hdim, thc)
        return thc, hp, hp // thc

    for tmc in tm_cands:
        for thc in th_cands:
            thc_e, hp, nk = _expand(thc)
            need = _vmem_need(tmc, thc_e, nk, cin, cout, isz)
            if need <= budget:
                return tmc, thc_e, nk, hp, need

    # Nothing fits the budget: fall back to the smallest-footprint combination.
    tmc = tm_cands[-1]
    thc_e, hp, nk = _expand(th_cands[-1])
    return tmc, thc_e, nk, hp, _vmem_need(tmc, thc_e, nk, cin, cout, isz)


# ----------------------------------------------------------------------------
# Wrapper
# ----------------------------------------------------------------------------
@functools.partial(jax.jit, static_argnames=("tm", "th", "mxu_dtype"))
def mlp_forward(x, w1, b1, w2, b2, *, tm=None, th=None, mxu_dtype=None):
    """x: [B, S, Cin]; w1: [Cin, H]; b1: [H]; w2: [H, Cout]; b2: [Cout]."""
    B, S, Cin = x.shape
    H = w1.shape[1]
    Cout = w2.shape[1]
    M = B * S

    isz = (jnp.dtype(x.dtype).itemsize, jnp.dtype(w1.dtype).itemsize,
           jnp.dtype(b1.dtype).itemsize, jnp.dtype(w2.dtype).itemsize,
           jnp.dtype(b2.dtype).itemsize, jnp.dtype(x.dtype).itemsize)

    vmem_cap = _vmem_capacity_bytes()
    budget = int(vmem_cap * 0.8)

    tm_eff, th_eff, nk, Hp, need = _choose_tiles(M, Cin, H, Cout, isz, budget,
                                                 tm=tm, th=th)

    # Megacore heuristic: only split a single row tile in two when >1 TC exists.
    m_min = _round_up(M, _SUBLANE)
    if tm is None and tm_eff >= m_min and m_min >= 16 and _num_tensorcores() > 1:
        tm_eff = _round_up(pl.cdiv(m_min, 2), _SUBLANE)
        need = _vmem_need(tm_eff, th_eff, nk, Cin, Cout, isz)

    Mp = _round_up(M, tm_eff)

    # --- pad inputs ---------------------------------------------------------
    x2 = x.reshape(M, Cin)
    if Mp != M:
        x2 = jnp.pad(x2, ((0, Mp - M), (0, 0)))
    if Hp != H:
        w1p = jnp.pad(w1, ((0, 0), (0, Hp - H)))
        b1p = jnp.pad(b1, ((0, Hp - H),))
        w2p = jnp.pad(w2, ((0, Hp - H), (0, 0)))
    else:
        w1p, b1p, w2p = w1, b1, w2
    b1_2 = b1p.reshape(1, Hp)
    b2_2 = b2.reshape(1, Cout)

    # --- compiler params: scoped VMEM limit sized from the real footprint ----
    vmem_limit = min(max(int(need * 1.3), 32 << 20), int(vmem_cap * 0.9))
    cp_kwargs = {"vmem_limit_bytes": int(vmem_limit)}

    if nk == 1:
        cp_kwargs["dimension_semantics"] = ("parallel",)
        grid = (Mp // tm_eff,)
        in_specs = [
            pl.BlockSpec((tm_eff, Cin), lambda i: (i, 0)),            # x row tile
            _single_buffered_spec((Cin, Hp), lambda i: (0, 0)),       # W1 resident
            _single_buffered_spec((1, Hp), lambda i: (0, 0)),         # b1 resident
            _single_buffered_spec((Hp, Cout), lambda i: (0, 0)),      # W2 resident
            _single_buffered_spec((1, Cout), lambda i: (0, 0)),       # b2 resident
        ]
        out_specs = pl.BlockSpec((tm_eff, Cout), lambda i: (i, 0))
        scratch_shapes = []
        kernel = functools.partial(_mlp_kernel_resident, mxu_dtype=mxu_dtype)
    else:
        cp_kwargs["dimension_semantics"] = ("parallel", "arbitrary")
        grid = (Mp // tm_eff, nk)
        in_specs = [
            pl.BlockSpec((tm_eff, Cin), lambda i, k: (i, 0)),          # x (resident over k)
            pl.BlockSpec((Cin, th_eff), lambda i, k: (0, k)),          # W1 column chunk
            pl.BlockSpec((1, th_eff), lambda i, k: (0, k)),            # b1 chunk
            pl.BlockSpec((th_eff, Cout), lambda i, k: (k, 0)),         # W2 row chunk
            _single_buffered_spec((1, Cout), lambda i, k: (0, 0)),     # b2 (grid-invariant)
        ]
        out_specs = pl.BlockSpec((tm_eff, Cout), lambda i, k: (i, 0))
        scratch_shapes = [pltpu.VMEM((tm_eff, Cout), jnp.float32)]
        kernel = functools.partial(_mlp_kernel_hchunk, mxu_dtype=mxu_dtype)

    out2 = pl.pallas_call(
        kernel,
        out_shape=jax.ShapeDtypeStruct((Mp, Cout), x.dtype),
        grid_spec=pltpu.PrefetchScalarGridSpec(
            num_scalar_prefetch=0,
            grid=grid,
            in_specs=in_specs,
            out_specs=out_specs,
            scratch_shapes=scratch_shapes,
        ),
        compiler_params=pltpu.CompilerParams(**cp_kwargs),
    )(x2, w1p, b1_2, w2p, b2_2)

    return out2[:M].reshape(B, S, Cout)


# ----------------------------------------------------------------------------
# Self-test helpers
# ----------------------------------------------------------------------------
def _init_params(key, in_features, hidden_features, out_features,
                 dtype=jnp.float32):
    """Deterministic init mirroring nn.Linear shapes (weights stored [in, out])."""
    k1, k2, k3, k4 = jax.random.split(key, 4)
    lim1 = 1.0 / math.sqrt(in_features)
    lim2 = 1.0 / math.sqrt(hidden_features)
    w1 = jax.random.uniform(k1, (in_features, hidden_features), dtype, -lim1, lim1)
    b1 = jax.random.uniform(k2, (hidden_features,), dtype, -lim1, lim1)
    w2 = jax.random.uniform(k3, (hidden_features, out_features), dtype, -lim2, lim2)
    b2 = jax.random.uniform(k4, (out_features,), dtype, -lim2, lim2)
    return w1, b1, w2, b2


def _reference(x, w1, b1, w2, b2):
    hp = jax.lax.Precision.HIGHEST
    h = jnp.einsum("bsc,ch->bsh", x, w1, precision=hp) + b1
    h = 0.5 * h * (1.0 + jax.lax.erf(h / jnp.sqrt(2.0)))
    return jnp.einsum("bsh,ho->bso", h, w2, precision=hp) + b2


if __name__ == "__main__":
    key = jax.random.PRNGKey(0)
    k1, k2, k3, kp1, kp2 = jax.random.split(key, 5)
    TOL = dict(atol=2e-2, rtol=2e-2)

    # Case 1: fully-resident weights, even M (B=2, S=8, Cin=32, H=64, Cout=32).
    w1, b1, w2, b2 = _init_params(kp1, 32, 64, 32)
    x_a = jax.random.normal(k1, (2, 8, 32), jnp.float32)
    y_a = mlp_forward(x_a, w1, b1, w2, b2)
    jax.block_until_ready(y_a)
    assert y_a.shape == (2, 8, 32)
    assert jnp.allclose(y_a, _reference(x_a, w1, b1, w2, b2), **TOL), \
        "mismatch (resident weights, even M)"

    # Case 2: M not divisible by the row tile (B=3, S=7 -> M=21, padded rows).
    x_b = jax.random.normal(k2, (3, 7, 32), jnp.float32)
    y_b = mlp_forward(x_b, w1, b1, w2, b2)
    jax.block_until_ready(y_b)
    assert y_b.shape == (3, 7, 32)
    assert jnp.allclose(y_b, _reference(x_b, w1, b1, w2, b2), **TOL), \
        "mismatch (padded M)"

    # Case 3: exercise the H-chunked (K-tile) accumulator path with H padding
    # (H=200 forced to th=128 -> 2 chunks, padded to 256).
    w1c, b1c, w2c, b2c = _init_params(kp2, 32, 200, 32)
    x_c = jax.random.normal(k3, (2, 8, 32), jnp.float32)
    y_c = mlp_forward(x_c, w1c, b1c, w2c, b2c, th=128)
    jax.block_until_ready(y_c)
    assert y_c.shape == (2, 8, 32)
    assert jnp.allclose(y_c, _reference(x_c, w1c, b1c, w2c, b2c), **TOL), \
        "mismatch (H-chunked accumulator path)"

    print("KERNEL_OK")
</pallas_src>

<mosaic_0001>
module attributes {stable_mosaic.version = 11 : i64} {
  func.func @_mlp_kernel_resident(%arg0: i32, %arg1: memref<16x32xf32, #tpu.memory_space<vmem>>, %arg2: memref<32x64xf32, #tpu.memory_space<vmem>>, %arg3: memref<1x64xf32, #tpu.memory_space<vmem>>, %arg4: memref<64x32xf32, #tpu.memory_space<vmem>>, %arg5: memref<1x32xf32, #tpu.memory_space<vmem>>, %arg6: memref<16x32xf32, #tpu.memory_space<vmem>>) attributes {dimension_semantics = [#tpu.dimension_semantics<parallel>], iteration_bounds = array<i64: 1>, scalar_prefetch = 0 : i64, scratch_operands = 0 : i64, tpu.core_type = #tpu.core_type<tc>, window_params = [{transform_indices = @transform_0, window_bounds = array<i64: 16, 32>}, {pipeline_mode = #tpu.pipeline_mode<synchronous>, transform_indices = @transform_1, window_bounds = array<i64: 32, 64>}, {pipeline_mode = #tpu.pipeline_mode<synchronous>, transform_indices = @transform_2, window_bounds = array<i64: 1, 64>}, {pipeline_mode = #tpu.pipeline_mode<synchronous>, transform_indices = @transform_3, window_bounds = array<i64: 64, 32>}, {pipeline_mode = #tpu.pipeline_mode<synchronous>, transform_indices = @transform_4, window_bounds = array<i64: 1, 32>}, {transform_indices = @transform_5, window_bounds = array<i64: 16, 32>}]} {
    %c0 = arith.constant 0 : index
    %c0_0 = arith.constant 0 : index
    %0 = vector.load %arg1[%c0, %c0_0] : memref<16x32xf32, #tpu.memory_space<vmem>>, vector<16x32xf32>
    %c0_1 = arith.constant 0 : index
    %c0_2 = arith.constant 0 : index
    %1 = vector.load %arg2[%c0_1, %c0_2] : memref<32x64xf32, #tpu.memory_space<vmem>>, vector<32x64xf32>
    %c0_3 = arith.constant 0 : index
    %c0_4 = arith.constant 0 : index
    %2 = vector.load %arg4[%c0_3, %c0_4] : memref<64x32xf32, #tpu.memory_space<vmem>>, vector<64x32xf32>
    %cst = arith.constant dense<0.000000e+00> : vector<16x64xf32>
    %3 = tpu.matmul %0, %1, %cst {dimension_numbers = #tpu.dot_dimension_numbers<[1], [0], [0], [1], [0, 0, 1, 1], [], []>} : vector<16x32xf32>, vector<32x64xf32>, vector<16x64xf32> -> vector<16x64xf32>
    %c0_5 = arith.constant 0 : index
    %c0_6 = arith.constant 0 : index
    %4 = vector.load %arg3[%c0_5, %c0_6] : memref<1x64xf32, #tpu.memory_space<vmem>>, vector<1x64xf32>
    %5 = vector.broadcast %4 : vector<1x64xf32> to vector<16x64xf32>
    %6 = arith.addf %3, %5 : vector<16x64xf32>
    %cst_7 = arith.constant 5.000000e-01 : f32
    %7 = vector.broadcast %cst_7 : f32 to vector<16x64xf32>
    %8 = arith.mulf %7, %6 : vector<16x64xf32>
    %cst_8 = arith.constant 0.707106769 : f32
    %9 = vector.broadcast %cst_8 : f32 to vector<16x64xf32>
    %10 = arith.mulf %6, %9 : vector<16x64xf32>
    %11 = math.erf %10 : vector<16x64xf32>
    %cst_9 = arith.constant 1.000000e+00 : f32
    %12 = vector.broadcast %cst_9 : f32 to vector<16x64xf32>
    %13 = arith.addf %12, %11 : vector<16x64xf32>
    %14 = arith.mulf %8, %13 : vector<16x64xf32>
    %cst_10 = arith.constant dense<0.000000e+00> : vector<16x32xf32>
    %15 = tpu.matmul %14, %2, %cst_10 {dimension_numbers = #tpu.dot_dimension_numbers<[1], [0], [0], [1], [0, 0, 1, 1], [], []>} : vector<16x64xf32>, vector<64x32xf32>, vector<16x32xf32> -> vector<16x32xf32>
    %c0_11 = arith.constant 0 : index
    %c0_12 = arith.constant 0 : index
    %16 = vector.load %arg5[%c0_11, %c0_12] : memref<1x32xf32, #tpu.memory_space<vmem>>, vector<1x32xf32>
    %17 = vector.broadcast %16 : vector<1x32xf32> to vector<16x32xf32>
    %18 = arith.addf %15, %17 : vector<16x32xf32>
    %c0_13 = arith.constant 0 : index
    %c0_14 = arith.constant 0 : index
    %19 = vector.load %arg6[%c0_13, %c0_14] : memref<16x32xf32, #tpu.memory_space<vmem>>, vector<16x32xf32>
    tpu.vector_store %arg6[%c0_13, %c0_14], %18 {strides = array<i32>} : memref<16x32xf32, #tpu.memory_space<vmem>>, vector<16x32xf32>,
    return
  }
  func.func @transform_0(%arg0: i32) -> (i32, i32) {
    %c0_i32 = arith.constant 0 : i32
    %c0_i32_0 = arith.constant 0 : i32
    return %arg0, %c0_i32 : i32, i32
  }
  func.func @transform_1(%arg0: i32) -> (i32, i32) {
    %c0_i32 = arith.constant 0 : i32
    %c0_i32_0 = arith.constant 0 : i32
    %c0_i32_1 = arith.constant 0 : i32
    return %c0_i32, %c0_i32_0 : i32, i32
  }
  func.func @transform_2(%arg0: i32) -> (i32, i32) {
    %c0_i32 = arith.constant 0 : i32
    %c0_i32_0 = arith.constant 0 : i32
    %c0_i32_1 = arith.constant 0 : i32
    return %c0_i32, %c0_i32_0 : i32, i32
  }
  func.func @transform_3(%arg0: i32) -> (i32, i32) {
    %c0_i32 = arith.constant 0 : i32
    %c0_i32_0 = arith.constant 0 : i32
    %c0_i32_1 = arith.constant 0 : i32
    return %c0_i32, %c0_i32_0 : i32, i32
  }
  func.func @transform_4(%arg0: i32) -> (i32, i32) {
    %c0_i32 = arith.constant 0 : i32
    %c0_i32_0 = arith.constant 0 : i32
    %c0_i32_1 = arith.constant 0 : i32
    return %c0_i32, %c0_i32_0 : i32, i32
  }
  func.func @transform_5(%arg0: i32) -> (i32, i32) {
    %c0_i32 = arith.constant 0 : i32
    %c0_i32_0 = arith.constant 0 : i32
    return %arg0, %c0_i32 : i32, i32
  }
}

</mosaic_0001>

<bundles_post_ra>
// kernel: mlp_forward.1
= control target key start
LH: loop header
LB: loop body
LE: loop exit
PB: predicated region body
PF: predicated region fallthrough
CT: control target
= control target key end

     0   :  { %s382_s0 = inlined_call_operand.vmem [shape: f32[16,32], index: 0, kind: input, shape index: {}]   ;;  %s383_s1 = inlined_call_operand.vmem [shape: f32[32,64], index: 1, kind: input, shape index: {}]   ;;  %s384_s2 = inlined_call_operand.vmem [shape: f32[1,64], index: 2, kind: input, shape index: {}]   ;;  %s385_s3 = inlined_call_operand.vmem [shape: f32[64,32], index: 3, kind: input, shape index: {}]   ;;  %s386_s4 = inlined_call_operand.vmem [shape: f32[1,32], index: 4, kind: input, shape index: {}]   ;;  %s387_s5 = inlined_call_operand.hbm [shape: f32[16,32], index: 5, kind: output, shape index: {}]  }
   0x1   :  { %v26_v0 = vld [vmem:[%s383_s1 + $0x18] sm:$0xff]  ;;  %v25_v1 = vld [vmem:[%s383_s1 + $0x10] sm:$0xff]  ;;  %v24_v2 = vld [vmem:[%s383_s1 + $0x8] sm:$0xff] }
   0x2   :  { %58 = vmatpush.msra.mxu0 %v26_v0  ;;  %217 = vmatpush.msra.mxu3 %v26_v0 }
   0x4   :  { %59 = vmatpush.msra.mxu0 %v25_v1  ;;  %218 = vmatpush.msra.mxu3 %v25_v1 }
   0x5   :  { %10 = vsyncpa [#allocation3], 0  ;;  %v23_v3 = vld [vmem:[%s383_s1] sm:$0xff]  ;;  %vm39_vm0 = vcmask 261120   ;;  %v22_v5 = vld [vmem:[%s382_s0 + $0x8] sm:$0xff]  ;;  %vm161_vm9 = vcmask 523264  }
   0x6   :  { %60 = vmatpush.msra.mxu0 %v24_v2  ;;  %219 = vmatpush.msra.mxu3 %v24_v2  ;;  %v21_v4 = vld [vmem:[%s382_s0] sm:$0xff]  ;;  %v34_v14 = vld [vmem:[%s385_s3 + $0x38] sm:$0xff]  ;;  %v33_v18 = vld [vmem:[%s385_s3 + $0x30] sm:$0xff]  ;;  %s264_s21 = smov [#allocation2]   ;;  %s199_s25 = sshll.u32 %s387_s5, 4  ;;  %s200_s25 = int_to_ptr.hbm [resolvable:$true] %s199_s25 }
   0x7   :  { %v232_v6 = vld [vmem:[%s384_s2] ss:$0 sm:$0xff]  ;;  %176 = vmatpush.msra.mxu1 %v34_v14  ;;  %221 = vmatpush.msra.mxu2 %v34_v14  ;;  %v32_v22 = vld [vmem:[%s385_s3 + $0x28] sm:$0xff]  ;;  %v30_v31 = vld [vmem:[%s385_s3 + $0x18] sm:$0xff]  ;;  %s197_s22 = sshll.u32 %s264_s21, 4  ;;  %s265_s26 = smov 128   ;;  %s198_s22 = int_to_ptr.vmem [resolvable:$true] %s197_s22 }
   0x8   :  { %61 = vmatpush.msra.mxu0 %v23_v3  ;;  %220 = vmatpush.msra.mxu3 %v23_v3  ;;  %v31_v26 = vld [vmem:[%s385_s3 + $0x20] sm:$0xff]  ;;  %v29_v35 = vld [vmem:[%s385_s3 + $0x10] sm:$0xff]  ;;  %v28_v40 = vld [vmem:[%s385_s3 + $0x8] sm:$0xff]  ;;  %s266_s27 = smov 8  }
   0x9   :  { %211 = vmatmul.msk.f32.vlgmr.msra.gmra.mxu0 %vm39_vm0, %v21_v4  ;;  %212 = vmatmul.msk.f32.vlgmr.msra.gmra.mxu3 %vm39_vm0, %v22_v5  ;;  %v27_v42 = vld [vmem:[%s385_s3] sm:$0xff] }
   0xa   :  { %177 = vmatpush.msra.mxu1 %v33_v18  ;;  %222 = vmatpush.msra.mxu2 %v33_v18 }
   0xc   :  { %178 = vmatpush.msra.mxu1 %v32_v22  ;;  %223 = vmatpush.msra.mxu2 %v32_v22 }
   0xe   :  { %179 = vmatpush.msra.mxu1 %v31_v26  ;;  %224 = vmatpush.msra.mxu2 %v31_v26 }
  0x10   :  { %180 = vmatpush.msra.mxu1 %v30_v31  ;;  %225 = vmatpush.msra.mxu2 %v30_v31 }
  0x12   :  { %181 = vmatpush.msra.mxu1 %v29_v35  ;;  %226 = vmatpush.msra.mxu2 %v29_v35 }
  0x14   :  { %182 = vmatpush.msra.mxu1 %v28_v40  ;;  %227 = vmatpush.msra.mxu2 %v28_v40 }
  0x16   :  { %183 = vmatpush.msra.mxu1 %v27_v42  ;;  %228 = vmatpush.msra.mxu2 %v27_v42 }
  0x86   :  { %v63_v7 = vpop.f32.mrf.mxu0 }
  0x87   :  { %v320_v8 = vadd.f32 %v232_v6, %v63_v7 }
  0x89   :  { %v323_v9 = vmul.f32 0.70710677, %v320_v8  ;;  %v69_v26 = vmul.f32 0.5, %v320_v8  ;;  %v233_v8 = vld [vmem:[%s386_s4] ss:$0 sm:$0xff] }
  0x8b   :  { %v73_v10 = vmul.f32 %v323_v9, %v323_v9 }
  0x8c   :  { %v66_v11 = vpop.f32.mrf.mxu3 }
  0x8d   :  { %v327_v12 = vmin.f32 %v73_v10, 16.0  ;;  %v329_v13 = vadd.f32 %v232_v6, %v66_v11 }
  0x8f   :  { %v75_v15 = vmul.f32 2.1237322e-06, %v327_v12  ;;  %v86_v16 = vmul.f32 3.8918573e-05, %v327_v12  ;;  %v337_v17 = vmul.f32 0.70710677, %v329_v13 }
  0x91   :  { %v76_v19 = vadd.f32 0.00028619796, %v75_v15  ;;  %v87_v20 = vadd.f32 0.001143296, %v86_v16  ;;  %v113_v21 = vmul.f32 %v337_v17, %v337_v17 }
  0x93   :  { %v77_v23 = vmul.f32 %v76_v19, %v327_v12  ;;  %v88_v24 = vmul.f32 %v87_v20, %v327_v12  ;;  %v114_v25 = vmin.f32 %v113_v21, 16.0 }
  0x95   :  { %v78_v27 = vadd.f32 0.0036580483, %v77_v23  ;;  %v89_v28 = vadd.f32 0.014752088, %v88_v24  ;;  %v115_v29 = vmul.f32 2.1237322e-06, %v114_v25 }
  0x96   :  { %v126_v30 = vmul.f32 3.8918573e-05, %v114_v25 }
  0x97   :  { %v90_v32 = vmul.f32 %v89_v28, %v327_v12  ;;  %v116_v33 = vadd.f32 0.00028619796, %v115_v29  ;;  %v79_v37 = vmul.f32 %v78_v27, %v327_v12 }
  0x98   :  { %v127_v34 = vadd.f32 0.001143296, %v126_v30 }
  0x99   :  { %v91_v36 = vadd.f32 0.112945676, %v90_v32  ;;  %v117_v38 = vmul.f32 %v116_v33, %v114_v25  ;;  %v80_v46 = vadd.f32 0.05243302, %v79_v37  ;;  %v70_v33 = vmul.f32 0.5, %v329_v13 }
  0x9a   :  { %v128_v39 = vmul.f32 %v127_v34, %v114_v25 }
  0x9b   :  { %v92_v41 = vmul.f32 %v91_v36, %v327_v12  ;;  %v118_v45 = vadd.f32 0.0036580483, %v117_v38  ;;  %v81_v52 = vmul.f32 %v80_v46, %v327_v12 }
  0x9c   :  { %v129_v43 = vadd.f32 0.014752088, %v128_v39 }
  0x9d   :  { %v93_v44 = vadd.f32 0.4994258, %v92_v41  ;;  %v119_v51 = vmul.f32 %v118_v45, %v114_v25  ;;  %v82_v56 = vadd.f32 0.18741608, %v81_v52 }
  0x9e   :  { %v130_v47 = vmul.f32 %v129_v43, %v114_v25 }
  0x9f   :  { %v94_v48 = vmul.f32 %v93_v44, %v327_v12  ;;  %v120_v55 = vadd.f32 0.05243302, %v119_v51  ;;  %v83_v61 = vmul.f32 %v82_v56, %v327_v12 }
  0xa0   :  { %v131_v49 = vadd.f32 0.112945676, %v130_v47 }
  0xa1   :  { %v95_v50 = vadd.f32 1.0, %v94_v48  ;;  %v121_v60 = vmul.f32 %v120_v55, %v114_v25  ;;  %v84_v2 = vadd.f32 1.1283791, %v83_v61 }
  0xa2   :  { %v132_v53 = vmul.f32 %v131_v49, %v114_v25 }
  0xa3   :  { %234 = vrcp.f32 %v95_v50  ;;  %v107_v0 = vand.u32 2147483648, %v95_v50  ;;  %v122_v1 = vadd.f32 0.18741608, %v121_v60  ;;  %v105_v4 = vand.u32 2147483647, %v95_v50 }
  0xa4   :  { %v133_v54 = vadd.f32 0.4994258, %v132_v53  ;;  %vm101_vm2 = vweird.f32 %v95_v50  ;;  %v85_v14 = vmul.f32 %v84_v2, %v323_v9 }
  0xa5   :  { %v108_v7 = vor.u32 1.1754944e-38, %v107_v0  ;;  %v123_v10 = vmul.f32 %v122_v1, %v114_v25  ;;  %vm106_vm4 = vcmp.eq.f32.partialorder %v105_v4, 8.507059e+37 }
  0xa6   :  { %v134_v57 = vmul.f32 %v133_v54, %v114_v25 }
  0xa7   :  { %v124_v20 = vadd.f32 1.1283791, %v123_v10 }
  0xa8   :  { %v135_v58 = vadd.f32 1.0, %v134_v57 }
  0xa9   :  { %v235_v59 = vpop.eup %234  ;;  %v125_v9 = vmul.f32 %v124_v20, %v337_v17 }
  0xaa   :  { %v97_v62 = vmul.f32 %v235_v59, %v95_v50  ;;  %236 = vrcp.f32 %v135_v58  ;;  %vm102_vm1 = vweird.f32 %v235_v59  ;;  %v147_v19 = vand.u32 2147483648, %v135_v58 }
  0xab   :  { %vm103_vm3 = vmor %vm101_vm2, %vm102_vm1  ;;  %v145_v22 = vand.u32 2147483647, %v135_v58  ;;  %vm141_vm6 = vweird.f32 %v135_v58 }
  0xac   :  { %v98_v63 = vsub.f32 1.0, %v97_v62  ;;  %v148_v25 = vor.u32 1.1754944e-38, %v147_v19 }
  0xad   :  { %vm146_vm8 = vcmp.eq.f32.partialorder %v145_v22, 8.507059e+37 }
  0xae   :  { %v99_v3 = vmul.f32 %v235_v59, %v98_v63 }
  0xb0   :  { %v237_v5 = vpop.eup %236  ;;  %v100_v6 = vadd.f32 %v235_v59, %v99_v3 }
  0xb1   :  { %v137_v11 = vmul.f32 %v237_v5, %v135_v58  ;;  %vm142_vm5 = vweird.f32 %v237_v5 }
  0xb2   :  { %v104_v15 = vsel %vm103_vm3, %v235_v59, %v100_v6  ;;  %vm143_vm7 = vmor %vm141_vm6, %vm142_vm5 }
  0xb3   :  { %v109_v12 = vsel %vm106_vm4, %v108_v7, %v104_v15  ;;  %v138_v16 = vsub.f32 1.0, %v137_v11 }
  0xb4   :  { %v110_v18 = vmul.f32 %v109_v12, %v85_v14 }
  0xb5   :  { %v139_v21 = vmul.f32 %v237_v5, %v138_v16 }
  0xb6   :  { %v213_v23 = vclamps-f32 %v110_v18, 1.0 }
  0xb7   :  { %v140_v24 = vadd.f32 %v237_v5, %v139_v21 }
  0xb8   :  { %v153_v27 = vadd.f32 1.0, %v213_v23 }
  0xb9   :  { %v144_v28 = vsel %vm143_vm7, %v237_v5, %v140_v24 }
  0xba   :  { %v149_v29 = vsel %vm146_vm8, %v148_v25, %v144_v28  ;;  %v155_v30 = vmul.f32 %v153_v27, %v69_v26 }
  0xbb   :  { %v150_v31 = vmul.f32 %v149_v29, %v125_v9 }
  0xbc   :  { %215 = vmatmul.msk.f32.vlgmr.msra.gmra.mxu1 %vm161_vm9, %v155_v30 }
  0xbd   :  { %v214_v32 = vclamps-f32 %v150_v31, 1.0 }
  0xbf   :  { %v154_v34 = vadd.f32 1.0, %v214_v32 }
  0xc1   :  { %v156_v35 = vmul.f32 %v154_v34, %v70_v33 }
  0xc3   :  { %216 = vmatmul.msk.f32.vlgmr.msra.gmra.mxu2 %vm161_vm9, %v156_v35 }
 0x139   :  { %v185_v36 = vpop.f32.mrf.mxu1 }
 0x13a   :  { %v186_v37 = vadd.f32 %v233_v8, %v185_v36 }
 0x13c   :  { %191 = vst.msk [vmem:[#allocation2] sm:$0xff] %vm39_vm0, %v186_v37 }
 0x146   :  { %v188_v17 = vpop.f32.mrf.mxu2 }
 0x147   :  { %v189_v13 = vadd.f32 %v233_v8, %v188_v17 }
 0x149   :  { %192 = vst.msk [vmem:[#allocation2 + $0x8] sm:$0xff] %vm39_vm0, %v189_v13 }
 0x14a   :  { %205 = dma.vmem_to_hbm [thread:$0]  %s198_s22, 256, %s200_s25, [#allocation3], %s265_s26, %s265_s26, %s266_s27  }
 0x14b   :  { %262 = dma.done.wait [#allocation3], 256  }
 0x14c   :  { %263 = vsyncadd [#allocation3], 4294967040 }
 0x14d   :  { %210 = vsyncpa [#allocation3], 1 }

</bundles_post_ra>
